<compile_context>
chip_gen: v7x
topology: tpu7x:2x2x1
jax: 0.10.0
libtpu: 0.0.40
codegen_flags: <defaults>
</compile_context>

<pallas_src>
import functools

import numpy as np
import jax
import jax.numpy as jnp
from jax.experimental import pallas as pl
from jax.experimental.pallas import tpu as pltpu


def _win_norm_kernel(x_ref, mask_ref, scal_ref, lmda_ref, o_ref,
                     *, eps, inv_hw, inv_hwm1):
    # x_ref   : (r_blk, HW)  input dtype -- per-(n,c) flattened spatial rows
    # mask_ref: (1,     HW)  f32         -- 1.0 inside the sampled window
    # scal_ref: (1,    128)  f32         -- [0]=1/cnt, [1]=1/(cnt-1), rest unused
    # lmda_ref: (r_blk, 1)   f32         -- Beta(alpha,alpha) mix weight per row
    # o_ref   : (r_blk, HW)  input dtype
    xf = x_ref[...].astype(jnp.float32)
    m = mask_ref[...]
    s = scal_ref[...]
    lmda = lmda_ref[...]

    # --- fused one-pass raw moments (single traversal of the x tile) ---------
    xm = xf * m
    s1 = jnp.sum(xf, axis=1, keepdims=True)          # sum x
    s2 = jnp.sum(xf * xf, axis=1, keepdims=True)     # sum x^2
    s1m = jnp.sum(xm, axis=1, keepdims=True)         # sum x*m
    s2m = jnp.sum(xf * xm, axis=1, keepdims=True)    # sum x^2*m

    # --- global statistics (torch.std_mean default: unbiased, correction=1) --
    mean_g = s1 * inv_hw
    var_g = (s2 - s1 * mean_g) * inv_hwm1
    std_g = jnp.sqrt(jnp.maximum(var_g, 0.0))        # clamp: cancellation guard

    # --- window statistics over the masked region -----------------------------
    inv_cnt = s[:, 0:1]                              # (1,1), broadcasts per row
    inv_cntm1 = s[:, 1:2]
    mean_w = s1m * inv_cnt
    var_w = (s2m - s1m * mean_w) * inv_cntm1
    std_w = jnp.sqrt(jnp.maximum(var_w, 0.0))

    # --- mix and normalize -----------------------------------------------------
    mean = mean_w * lmda + mean_g * (1.0 - lmda)
    std = std_w * lmda + std_g * (1.0 - lmda)

    denom = std + eps
    r = pl.reciprocal(denom, approx=True)            # EUP slot, ~free
    r = r * (2.0 - denom * r)                        # 1 Newton step -> ~f32 exact
    o_ref[...] = ((xf - mean) * r).astype(o_ref.dtype)


def _choose_row_block(R, HW, in_bytes, out_bytes, block_budget):
    """Largest sublane-aligned row tile whose pipelined blocks fit the budget."""
    sub = 16 if min(in_bytes, out_bytes) < 4 else 8      # bf16 packs 16 sublanes
    if R <= sub:
        return R                                         # full-dim block (exempt)
    # 2x double-buffered input + 2x output blocks + ~16 B/elem f32 temporaries
    per_row = HW * (2 * in_bytes + 2 * out_bytes + 16) + 64
    max_rows = max(sub, (block_budget // per_row) // sub * sub)
    r_blk = min(512, max_rows)                           # 512 rows amortizes the
    if r_blk >= R:                                       # ~0.35us/step overhead
        # Whole tensor fits in one block: still emit >= 2 grid steps so the v7x
        # megacore can shard the parallel row axis across its two TensorCores.
        r_blk = max(sub, ((R + 1) // 2 + sub - 1) // sub * sub)
    return r_blk


def window_norm_2d(x, mask2d, lmda, *, eps=1e-5):
    """x: (N, C, H, W) float (f32/bf16); mask2d: (H, W); lmda: (N, C)."""
    N, C, H, W = x.shape
    HW = H * W
    R = N * C

    # Pure reshapes of contiguous NCHW -> no extra HBM copies; x keeps its dtype.
    x2 = x.reshape(R, HW)
    m2 = mask2d.reshape(1, HW).astype(jnp.float32)
    l2 = lmda.reshape(R, 1).astype(jnp.float32)

    # Loop-invariant window-element count, hoisted out of the kernel: the two
    # reciprocals ride in a tiny resident VMEM row and are read by broadcast.
    cnt = jnp.sum(m2, dtype=jnp.float32)
    scal = jnp.zeros((1, 128), jnp.float32)
    scal = scal.at[0, :2].set(jnp.stack([1.0 / cnt, 1.0 / (cnt - 1.0)]))

    in_bytes = x.dtype.itemsize
    out_bytes = in_bytes
    try:
        vmem_cap = pltpu.get_tpu_info().vmem_capacity_bytes
    except Exception:  # pragma: no cover - conservative (v7x-sized) fallback
        vmem_cap = 64 * 1024 * 1024
    # block budget < scoped limit < physical VMEM, with headroom on every gen
    block_budget = max(8 << 20, min(vmem_cap // 3, 40 << 20))
    vmem_limit = int(min(vmem_cap * 3 // 4, 96 << 20))

    r_blk = _choose_row_block(R, HW, in_bytes, out_bytes, block_budget)
    # Partial last block is fine: reductions are strictly per-row, OOB rows are
    # never read across, and their writebacks are clipped by Pallas.
    grid = (pl.cdiv(R, r_blk),)

    kernel = functools.partial(
        _win_norm_kernel,
        eps=float(eps),
        inv_hw=1.0 / float(HW),
        inv_hwm1=1.0 / float(HW - 1),
    )

    out = pl.pallas_call(
        kernel,
        out_shape=jax.ShapeDtypeStruct((R, HW), x.dtype),
        grid_spec=pltpu.PrefetchScalarGridSpec(
            num_scalar_prefetch=0,
            grid=grid,
            in_specs=[
                pl.BlockSpec((r_blk, HW), lambda i: (i, 0)),  # x rows (lane-dense)
                pl.BlockSpec((1, HW), lambda i: (0, 0)),      # mask (resident)
                pl.BlockSpec((1, 128), lambda i: (0, 0)),     # cnt reciprocals
                pl.BlockSpec((r_blk, 1), lambda i: (i, 0)),   # lmda per row
            ],
            out_specs=pl.BlockSpec((r_blk, HW), lambda i: (i, 0)),
        ),
        compiler_params=pltpu.CompilerParams(
            dimension_semantics=("parallel",),
            vmem_limit_bytes=vmem_limit,
        ),
    )(x2, m2, scal, l2)

    return out.reshape(N, C, H, W)


def _sample_bbox_original(W_, H_, beta, bbx_thres, rng):
    """Host-side deterministic port of cn_rand_bbox(method='original').

    Note: cn_rand_bbox names size[2] (=H) 'W' and size[3] (=W) 'H'; bbx* crops
    dim 2 (height) and bby* crops dim 3 (width).  Call as (H, W, ...).
    """
    while True:
        ratio = rng.beta(beta, beta)
        cut_rat = np.sqrt(ratio)
        cut_w = int(W_ * cut_rat)
        cut_h = int(H_ * cut_rat)
        cx = int(rng.integers(W_))
        cy = int(rng.integers(H_))
        bbx1 = int(np.clip(cx - cut_w // 2, 0, W_))
        bby1 = int(np.clip(cy - cut_h // 2, 0, H_))
        bbx2 = int(np.clip(cx + cut_w // 2, 0, W_))
        bby2 = int(np.clip(cy + cut_h // 2, 0, H_))
        if float(bbx2 - bbx1) * (bby2 - bby1) / (W_ * H_) >= bbx_thres:
            return bbx1, bby1, bbx2, bby2


def _reference(x, mask2d, lmda, eps=1e-5):
    """Plain-JAX reference of the same math (two-pass, like torch.std_mean)."""
    N, C, H, W = x.shape
    m = mask2d.reshape(1, 1, H, W).astype(jnp.float32)
    xf = x.astype(jnp.float32)
    cnt = jnp.sum(m)
    hw = float(H * W)
    mean_g = jnp.sum(xf, axis=(2, 3), keepdims=True) / hw
    std_g = jnp.sqrt(jnp.sum((xf - mean_g) ** 2, axis=(2, 3), keepdims=True) / (hw - 1.0))
    mean_w = jnp.sum(xf * m, axis=(2, 3), keepdims=True) / cnt
    std_w = jnp.sqrt(jnp.sum(((xf - mean_w) ** 2) * m, axis=(2, 3), keepdims=True) / (cnt - 1.0))
    l = lmda.reshape(N, C, 1, 1).astype(jnp.float32)
    mean = mean_w * l + mean_g * (1.0 - l)
    std = std_w * l + std_g * (1.0 - l)
    return ((xf - mean) / (std + eps)).astype(x.dtype)


if __name__ == "__main__":
    # WindowNorm2d(num_features=4, mask_thres=0.7, alpha=0.1, mix=True,
    #              grid=False, affine=False) -- training-mode forward.
    N, C, H, W = 2, 4, 16, 16
    mask_thres = 0.7
    alpha = 0.1
    eps = 1e-5

    key = jax.random.PRNGKey(0)
    kx, kl = jax.random.split(key)
    x = jax.random.normal(kx, (N, C, H, W), dtype=jnp.float32)

    # deterministic bbox sample (numpy side, like the original cn_rand_bbox)
    rng = np.random.default_rng(0)
    bbx1, bby1, bbx2, bby2 = _sample_bbox_original(H, W, beta=1.0,
                                                   bbx_thres=mask_thres, rng=rng)
    mask_np = np.zeros((H, W), dtype=np.float32)
    mask_np[bbx1:bbx2, bby1:bby2] = 1.0   # bbx -> dim 2 (H), bby -> dim 3 (W)
    mask2d = jnp.asarray(mask_np)

    # lmda ~ Beta(alpha, alpha) per (N, C)  (== self.beta.sample((N,C,1,1)))
    lmda = jax.random.beta(kl, alpha, alpha, shape=(N, C), dtype=jnp.float32)

    # affine=False default; weight=ones / bias=zeros would be identity anyway.
    out = window_norm_2d(x, mask2d, lmda, eps=eps)
    out = jax.block_until_ready(out)

    ref = _reference(x, mask2d, lmda, eps=eps)
    assert out.shape == (N, C, H, W)
    np.testing.assert_allclose(np.asarray(out), np.asarray(ref),
                               rtol=1e-4, atol=1e-4)

    # TODO(synk): grid=True (SimMIM MaskGenerator) path uses a random boolean
    # token gather; not implemented (default grid=False path is covered).
    print("KERNEL_OK")
</pallas_src>

<mosaic_0001>
module attributes {stable_mosaic.version = 11 : i64} {
  func.func @_win_norm_kernel(%arg0: i32, %arg1: memref<8x256xf32, #tpu.memory_space<vmem>>, %arg2: memref<1x256xf32, #tpu.memory_space<vmem>>, %arg3: memref<1x128xf32, #tpu.memory_space<vmem>>, %arg4: memref<8x1xf32, #tpu.memory_space<vmem>>, %arg5: memref<8x256xf32, #tpu.memory_space<vmem>>) attributes {dimension_semantics = [#tpu.dimension_semantics<parallel>], iteration_bounds = array<i64: 1>, scalar_prefetch = 0 : i64, scratch_operands = 0 : i64, tpu.core_type = #tpu.core_type<tc>, window_params = [{transform_indices = @transform_0, window_bounds = array<i64: 8, 256>}, {pipeline_mode = #tpu.pipeline_mode<synchronous>, transform_indices = @transform_1, window_bounds = array<i64: 1, 256>}, {pipeline_mode = #tpu.pipeline_mode<synchronous>, transform_indices = @transform_2, window_bounds = array<i64: 1, 128>}, {transform_indices = @transform_3, window_bounds = array<i64: 8, 1>}, {transform_indices = @transform_4, window_bounds = array<i64: 8, 256>}]} {
    %c0 = arith.constant 0 : index
    %c0_0 = arith.constant 0 : index
    %0 = vector.load %arg1[%c0, %c0_0] : memref<8x256xf32, #tpu.memory_space<vmem>>, vector<8x256xf32>
    %c0_1 = arith.constant 0 : index
    %c0_2 = arith.constant 0 : index
    %1 = vector.load %arg2[%c0_1, %c0_2] : memref<1x256xf32, #tpu.memory_space<vmem>>, vector<1x256xf32>
    %c0_3 = arith.constant 0 : index
    %c0_4 = arith.constant 0 : index
    %2 = vector.load %arg3[%c0_3, %c0_4] : memref<1x128xf32, #tpu.memory_space<vmem>>, vector<1x128xf32>
    %c0_5 = arith.constant 0 : index
    %c0_6 = arith.constant 0 : index
    %3 = vector.load %arg4[%c0_5, %c0_6] : memref<8x1xf32, #tpu.memory_space<vmem>>, vector<8x1xf32>
    %4 = vector.broadcast %1 : vector<1x256xf32> to vector<8x256xf32>
    %5 = arith.mulf %0, %4 : vector<8x256xf32>
    %cst = arith.constant dense<0.000000e+00> : vector<8xf32>
    %6 = vector.multi_reduction <add>, %0, %cst [1] : vector<8x256xf32> to vector<8xf32>
    %7 = vector.shape_cast %6 : vector<8xf32> to vector<8x1xf32>
    %8 = arith.mulf %0, %0 : vector<8x256xf32>
    %cst_7 = arith.constant dense<0.000000e+00> : vector<8xf32>
    %9 = vector.multi_reduction <add>, %8, %cst_7 [1] : vector<8x256xf32> to vector<8xf32>
    %10 = vector.shape_cast %9 : vector<8xf32> to vector<8x1xf32>
    %cst_8 = arith.constant dense<0.000000e+00> : vector<8xf32>
    %11 = vector.multi_reduction <add>, %5, %cst_8 [1] : vector<8x256xf32> to vector<8xf32>
    %12 = vector.shape_cast %11 : vector<8xf32> to vector<8x1xf32>
    %13 = arith.mulf %0, %5 : vector<8x256xf32>
    %cst_9 = arith.constant dense<0.000000e+00> : vector<8xf32>
    %14 = vector.multi_reduction <add>, %13, %cst_9 [1] : vector<8x256xf32> to vector<8xf32>
    %15 = vector.shape_cast %14 : vector<8xf32> to vector<8x1xf32>
    %cst_10 = arith.constant 3.906250e-03 : f32
    %16 = vector.broadcast %cst_10 : f32 to vector<8x1xf32>
    %17 = arith.mulf %7, %16 : vector<8x1xf32>
    %18 = arith.mulf %7, %17 : vector<8x1xf32>
    %19 = arith.subf %10, %18 : vector<8x1xf32>
    %cst_11 = arith.constant 0.00392156886 : f32
    %20 = vector.broadcast %cst_11 : f32 to vector<8x1xf32>
    %21 = arith.mulf %19, %20 : vector<8x1xf32>
    %cst_12 = arith.constant 0.000000e+00 : f32
    %22 = vector.broadcast %cst_12 : f32 to vector<8x1xf32>
    %23 = arith.maximumf %21, %22 : vector<8x1xf32>
    %24 = math.sqrt %23 : vector<8x1xf32>
    %25 = vector.extract_strided_slice %2 {offsets = [0, 0], sizes = [1, 1], strides = [1, 1]} : vector<1x128xf32> to vector<1x1xf32>
    %26 = vector.extract_strided_slice %2 {offsets = [0, 1], sizes = [1, 1], strides = [1, 1]} : vector<1x128xf32> to vector<1x1xf32>
    %27 = vector.broadcast %25 : vector<1x1xf32> to vector<8x1xf32>
    %28 = arith.mulf %12, %27 : vector<8x1xf32>
    %29 = arith.mulf %12, %28 : vector<8x1xf32>
    %30 = arith.subf %15, %29 : vector<8x1xf32>
    %31 = vector.broadcast %26 : vector<1x1xf32> to vector<8x1xf32>
    %32 = arith.mulf %30, %31 : vector<8x1xf32>
    %cst_13 = arith.constant 0.000000e+00 : f32
    %33 = vector.broadcast %cst_13 : f32 to vector<8x1xf32>
    %34 = arith.maximumf %32, %33 : vector<8x1xf32>
    %35 = math.sqrt %34 : vector<8x1xf32>
    %36 = arith.mulf %28, %3 : vector<8x1xf32>
    %cst_14 = arith.constant 1.000000e+00 : f32
    %37 = vector.broadcast %cst_14 : f32 to vector<8x1xf32>
    %38 = arith.subf %37, %3 : vector<8x1xf32>
    %39 = arith.mulf %17, %38 : vector<8x1xf32>
    %40 = arith.addf %36, %39 : vector<8x1xf32>
    %41 = arith.mulf %35, %3 : vector<8x1xf32>
    %cst_15 = arith.constant 1.000000e+00 : f32
    %42 = vector.broadcast %cst_15 : f32 to vector<8x1xf32>
    %43 = arith.subf %42, %3 : vector<8x1xf32>
    %44 = arith.mulf %24, %43 : vector<8x1xf32>
    %45 = arith.addf %41, %44 : vector<8x1xf32>
    %cst_16 = arith.constant 9.99999974E-6 : f32
    %46 = vector.broadcast %cst_16 : f32 to vector<8x1xf32>
    %47 = arith.addf %45, %46 : vector<8x1xf32>
    %48 = tpu.reciprocal %47 {approx = true} : vector<8x1xf32> -> vector<8x1xf32>
    %49 = arith.mulf %47, %48 : vector<8x1xf32>
    %cst_17 = arith.constant 2.000000e+00 : f32
    %50 = vector.broadcast %cst_17 : f32 to vector<8x1xf32>
    %51 = arith.subf %50, %49 : vector<8x1xf32>
    %52 = arith.mulf %48, %51 : vector<8x1xf32>
    %53 = vector.broadcast %40 : vector<8x1xf32> to vector<8x256xf32>
    %54 = arith.subf %0, %53 : vector<8x256xf32>
    %55 = vector.broadcast %52 : vector<8x1xf32> to vector<8x256xf32>
    %56 = arith.mulf %54, %55 : vector<8x256xf32>
    %c0_18 = arith.constant 0 : index
    %c0_19 = arith.constant 0 : index
    %57 = vector.load %arg5[%c0_18, %c0_19] : memref<8x256xf32, #tpu.memory_space<vmem>>, vector<8x256xf32>
    tpu.vector_store %arg5[%c0_18, %c0_19], %56 {strides = array<i32>} : memref<8x256xf32, #tpu.memory_space<vmem>>, vector<8x256xf32>,
    return
  }
  func.func @transform_0(%arg0: i32) -> (i32, i32) {
    %c0_i32 = arith.constant 0 : i32
    %c0_i32_0 = arith.constant 0 : i32
    return %arg0, %c0_i32 : i32, i32
  }
  func.func @transform_1(%arg0: i32) -> (i32, i32) {
    %c0_i32 = arith.constant 0 : i32
    %c0_i32_0 = arith.constant 0 : i32
    %c0_i32_1 = arith.constant 0 : i32
    return %c0_i32, %c0_i32_0 : i32, i32
  }
  func.func @transform_2(%arg0: i32) -> (i32, i32) {
    %c0_i32 = arith.constant 0 : i32
    %c0_i32_0 = arith.constant 0 : i32
    %c0_i32_1 = arith.constant 0 : i32
    return %c0_i32, %c0_i32_0 : i32, i32
  }
  func.func @transform_3(%arg0: i32) -> (i32, i32) {
    %c0_i32 = arith.constant 0 : i32
    %c0_i32_0 = arith.constant 0 : i32
    return %arg0, %c0_i32 : i32, i32
  }
  func.func @transform_4(%arg0: i32) -> (i32, i32) {
    %c0_i32 = arith.constant 0 : i32
    %c0_i32_0 = arith.constant 0 : i32
    return %arg0, %c0_i32 : i32, i32
  }
}

</mosaic_0001>

<bundles_post_ra>
// kernel: tpu_custom_call.1
= control target key start
LH: loop header
LB: loop body
LE: loop exit
PB: predicated region body
PF: predicated region fallthrough
CT: control target
= control target key end

     0   :  { %9 = vsyncpa [#allocation3], 0  ;;  %s279_s0 = inlined_call_operand.hbm [shape: f32[8,256], index: 0, kind: input, shape index: {}]   ;;  %s280_s1 = inlined_call_operand.vmem [shape: f32[1,256], index: 1, kind: input, shape index: {}]   ;;  %s281_s2 = inlined_call_operand.vmem [shape: f32[1,128], index: 2, kind: input, shape index: {}]   ;;  %s282_s3 = inlined_call_operand.vmem [shape: f32[8,1], index: 3, kind: input, shape index: {}]   ;;  %s283_s4 = inlined_call_operand.hbm [shape: f32[8,256], index: 4, kind: output, shape index: {}]  }
   0x1   :  { %10 = vsyncpa [#allocation4], 0  ;;  %s201_s15 = smov [#allocation2]   ;;  %s153_s19 = scalar_lea.hbm %s279_s0, 256 }
   0x2   :  { %s17_s16 = sshll.u32 %s201_s15, 4  ;;  %p154_p0 = scmp.ne.s32.totalorder %s279_s0, %s153_s19  ;;  %s18_s16 = int_to_ptr.vmem [resolvable:$true] %s17_s16 }
   0x3   :  { %p157_p1 = scmp.lt.u32.totalorder %s153_s19, %s279_s0 }
   0x5   :  { %p159_p2 = pnand %p157_p1, %p154_p0 }
   0x7   :  { %162 = shalt.err (!%p159_p2)
}
   0x8   :  { %s163_s24 = scalar_lea.vmem %s18_s16, 256  ;;  %p168_p4 = scmp.lt.s32.totalorder %s18_s16, %s18_s16 }
   0x9   :  { %p164_p3 = scmp.ne.s32.totalorder %s18_s16, %s163_s24  ;;  %p169_p5 = scmp.lt.s32.totalorder %s163_s24, %s163_s24 }
   0xb   :  { %p170_p6 = por %p169_p5, %p168_p4 }
   0xd   :  { %p171_p7 = pnand %p170_p6, %p164_p3 }
   0xf   :  { %174 = shalt.err (!%p171_p7)
}
  0x10   :  { %20 = dma.hbm_to_vmem [thread:$0]  %s279_s0, 256, %s18_s16, [#allocation3]  }
  0x11   :  { %197 = dma.done.wait [#allocation3], 256  }
  0x12   :  { %198 = vsyncadd [#allocation3], 4294967040  ;;  %v36_v0 = vlaneseq  ;;  %v242_v4 = vld [vmem:[#allocation2] sm:$0xff]  ;;  %v244_v5 = vld [vmem:[#allocation2 + $0x8] sm:$0xff]  ;;  %v202_v20 = vmov 0   ;;  %s203_s29 = smov 127  }
  0x13   :  { %v32_v6 = vld [vmem:[%s280_s1] sm:$0x3]  ;;  %v48_v7 = vadd.f32 %v244_v5, %v242_v4  ;;  %v51_v8 = vmul.f32 %v242_v4, %v242_v4  ;;  %v52_v9 = vmul.f32 %v244_v5, %v244_v5  ;;  %145 = vset.pattern.permute.xlu1 %v202_v20  ;;  %146 = vset.pattern.permute.xlu0 %v202_v20 }
  0x14   :  { %v37_v1 = vshrl.u32 %v36_v0, 7  ;;  %v140_v19 = vld [vmem:[%s281_s2] ss:$0 sm:$0xff]  ;;  %s204_s2 = smov [#allocation5]  }
  0x15   :  { %49 = vadd.xlane.f32.xlu0 %v48_v7  ;;  %v53_v12 = vadd.f32 %v52_v9, %v51_v8  ;;  %v34_v22 = vld [vmem:[%s282_s3] sm:$0xff]  ;;  %s131_s3 = sshll.u32 %s204_s2, 4  ;;  %s132_s3 = int_to_ptr.vmem [resolvable:$true] %s131_s3 }
  0x16   :  { %v38_v2 = vsub.s32 0, %v37_v1  ;;  %v42_v3 = vsub.s32 1, %v37_v1  ;;  %v98_v26 = vsub.f32 1.0, %v34_v22  ;;  %s175_s6 = scalar_lea.vmem %s132_s3, 256  ;;  %p180_p9 = scmp.lt.s32.totalorder %s132_s3, %s132_s3 }
  0x17   :  { %54 = vadd.xlane.f32.xlu1 %v53_v12  ;;  %p176_p8 = scmp.ne.s32.totalorder %s132_s3, %s175_s6  ;;  %p181_p10 = scmp.lt.s32.totalorder %s175_s6, %s175_s6 }
  0x18   :  { %v39_v10 = vrot.slane %v32_v6, %v38_v2  ;;  %v43_v11 = vrot.slane %v32_v6, %v42_v3 }
  0x19   :  { %p182_p11 = por %p181_p10, %p180_p9 }
  0x1a   :  { %v46_v13 = vmul.f32 %v39_v10, %v242_v4  ;;  %v47_v14 = vmul.f32 %v43_v11, %v244_v5 }
  0x1b   :  { %p183_p12 = pnand %p182_p11, %p176_p8 }
  0x1c   :  { %v59_v15 = vmul.f32 %v46_v13, %v242_v4  ;;  %v56_v16 = vadd.f32 %v47_v14, %v46_v13  ;;  %v60_v17 = vmul.f32 %v47_v14, %v244_v5 }
  0x1e   :  { %57 = vadd.xlane.f32.xlu0 %v56_v16  ;;  %v61_v18 = vadd.f32 %v60_v17, %v59_v15 }
  0x20   :  { %62 = vadd.xlane.f32.xlu1 %v61_v18 }
  0x34   :  { %85 = vrot.lane.b32.xlu0 %v140_v19, %s203_s29 }
  0xa2   :  { %v50_v21 = vpop.xlane.xlu0 %49 }
  0xa3   :  { %v64_v23 = vmul.f32 0.00390625, %v50_v21 }
  0xa4   :  { %v55_v24 = vpop.xlane.xlu1 %54 }
  0xa5   :  { %v65_v25 = vmul.f32 %v64_v23, %v50_v21  ;;  %v99_v32 = vmul.f32 %v98_v26, %v64_v23 }
  0xa7   :  { %v66_v27 = vsub.f32 %v55_v24, %v65_v25 }
  0xa9   :  { %v67_v30 = vmul.f32 0.003921569, %v66_v27 }
  0xab   :  { %v58_v28 = vpop.xlane.xlu0 %57  ;;  %v68_v35 = vmax.f32 %v67_v30, 0.0 }
  0xac   :  { %v82_v29 = vmul.f32 %v140_v19, %v58_v28 }
  0xad   :  { %v63_v31 = vpop.xlane.xlu1 %62  ;;  %147 = vrsqrt.f32 %v68_v35  ;;  %vm71_vm0 = vcmp.eq.f32.partialorder %v68_v35, inf  ;;  %v74_v45 = vand.u32 2147483648, %v68_v35  ;;  %vm73_vm1 = vcmp.eq.f32.partialorder %v68_v35, 0.0 }
  0xae   :  { %v83_v33 = vmul.f32 %v82_v29, %v58_v28  ;;  %v97_v34 = vmul.f32 %v82_v29, %v34_v22 }
  0xaf   :  { %v86_v36 = vpop.permute.xlu0 %85 }
  0xb0   :  { %v84_v37 = vsub.f32 %v63_v31, %v83_v33  ;;  %v100_v38 = vadd.f32 %v99_v32, %v97_v34 }
  0xb2   :  { %v88_v39 = vmul.f32 %v86_v36, %v84_v37  ;;  %111 = vperm.xlu1 %145, %v100_v38  }
  0xb4   :  { %v89_v40 = vmax.f32 %v88_v39, 0.0 }
  0xb6   :  { %149 = vrsqrt.f32 %v89_v40  ;;  %vm92_vm2 = vcmp.eq.f32.partialorder %v89_v40, inf  ;;  %v95_v48 = vand.u32 2147483648, %v89_v40  ;;  %vm94_vm3 = vcmp.eq.f32.partialorder %v89_v40, 0.0 }
  0xb7   :  { %v148_v41 = vpop.eup %147 }
  0xb8   :  { %v70_v42 = vmul.f32 %v148_v41, %v68_v35 }
  0xba   :  { %v72_v43 = vsel %vm71_vm0, %v68_v35, %v70_v42 }
  0xbb   :  { %v75_v47 = vsel %vm73_vm1, %v74_v45, %v72_v43 }
  0xbc   :  { %v102_v52 = vmul.f32 %v98_v26, %v75_v47 }
  0xc0   :  { %v150_v44 = vpop.eup %149 }
  0xc1   :  { %v91_v46 = vmul.f32 %v150_v44, %v89_v40 }
  0xc3   :  { %v93_v49 = vsel %vm92_vm2, %v89_v40, %v91_v46 }
  0xc4   :  { %v96_v50 = vsel %vm94_vm3, %v95_v48, %v93_v49 }
  0xc5   :  { %v101_v51 = vmul.f32 %v96_v50, %v34_v22 }
  0xc7   :  { %v103_v53 = vadd.f32 %v102_v52, %v101_v51 }
  0xc9   :  { %v104_v54 = vadd.f32 1e-05, %v103_v53 }
  0xcb   :  { %151 = vrcp.f32 %v104_v54 }
  0xd5   :  { %v152_v55 = vpop.eup %151 }
  0xd6   :  { %v106_v56 = vmul.f32 %v152_v55, %v104_v54 }
  0xd8   :  { %v107_v57 = vsub.f32 2.0, %v106_v56 }
  0xda   :  { %v108_v58 = vmul.f32 %v152_v55, %v107_v57 }
  0xdc   :  { %118 = vperm.xlu1 %145, %v108_v58  }
 0x131   :  { %v112_v59 = vpop.permute.xlu1 %111 }
 0x132   :  { %v114_v60 = vsub.f32 %v242_v4, %v112_v59  ;;  %v115_v61 = vsub.f32 %v244_v5, %v112_v59 }
 0x15b   :  { %v119_v62 = vpop.permute.xlu1 %118 }
 0x15c   :  { %v121_v63 = vmul.f32 %v119_v62, %v114_v60  ;;  %v122_v0 = vmul.f32 %v119_v62, %v115_v61 }
 0x15e   :  { %123 = vst [vmem:[#allocation5] sm:$0xff] %v121_v63  ;;  %124 = vst [vmem:[#allocation5 + $0x8] sm:$0xff] %v122_v0 }
 0x15f   :  { %186 = shalt.err (!%p183_p12)
}
 0x160   :  { %s187_s9 = scalar_lea.hbm %s283_s4, 256 }
 0x161   :  { %p188_p13 = scmp.ne.s32.totalorder %s283_s4, %s187_s9  ;;  %p191_p0 = scmp.lt.u32.totalorder %s187_s9, %s283_s4 }
 0x163   :  { %p193_p1 = pnand %p191_p0, %p188_p13 }
 0x165   :  { %196 = shalt.err (!%p193_p1)
}
 0x166   :  { %134 = dma.vmem_to_hbm [thread:$0]  %s132_s3, 256, %s283_s4, [#allocation4]  }
 0x167   :  { %199 = dma.done.wait [#allocation4], 256  }
 0x168   :  { %200 = vsyncadd [#allocation4], 4294967040 }
 0x169   :  { %138 = vsyncpa [#allocation3], 1 }
 0x16a   :  { %139 = vsyncpa [#allocation4], 1 }

</bundles_post_ra>
